<compile_context>
chip_gen: v7x
topology: tpu7x:2x2x1
jax: 0.10.0
libtpu: 0.0.40
codegen_flags: <defaults>
</compile_context>

<pallas_src>
import jax
import jax.numpy as jnp
from jax import lax
from jax.experimental import pallas as pl
from jax.experimental.pallas import tpu as pltpu


def _ce_kernel(x_ref, label_ref, loss_ref):
    # x_ref:     (TM, C)  logits tile (original dtype)
    # label_ref: (TM, 1)  int32 labels tile (-100 / negative / out-of-range => ignored)
    # loss_ref:  (TM, 1)  float32 per-row loss (0 for ignored rows)
    x = x_ref[...].astype(jnp.float32)                         # cast in-register only
    labels = label_ref[...]                                    # (TM, 1) int32
    C = x.shape[-1]

    # numerically-stable log-sum-exp per row
    m = jnp.max(x, axis=-1, keepdims=True)                     # (TM, 1)
    s = jnp.sum(jnp.exp(x - m), axis=-1, keepdims=True)        # (TM, 1)
    lse = m + jnp.log(s)                                       # (TM, 1)

    # gather x[i, label[i]] via one-hot mask (no dynamic gather on TPU vregs)
    col_ids = lax.broadcasted_iota(jnp.int32, x.shape, 1)      # (TM, C)
    onehot = col_ids == labels                                 # broadcast (TM,1)->(TM,C)
    picked = jnp.sum(jnp.where(onehot, x, 0.0), axis=-1, keepdims=True)  # (TM, 1)

    # ignore_index / padded rows: label outside [0, C) contributes 0
    valid = (labels >= 0) & (labels < C)                       # (TM, 1)
    loss_ref[...] = jnp.where(valid, lse - picked, 0.0)


def _pick_row_tile(n_rows, n_classes, itemsize):
    # ~24 MiB budget for the two in-flight (double-buffered) logits tiles:
    # safe on v7x (64 MiB VMEM/TC) as well as v5e/v6e (128 MiB).
    budget = 24 * 1024 * 1024
    max_rows = budget // max(1, 2 * n_classes * itemsize)
    row_tile = int(min(max_rows, 2048))
    # never meaningfully larger than the (row-padded) problem
    row_tile = min(row_tile, ((n_rows + 7) // 8) * 8)
    row_tile = max(8, (row_tile // 8) * 8)
    return row_tile


def entropy_loss(x, label, *, row_tile=None):
    """Equivalent of EntropyLoss.forward (mean cross-entropy, ignore_index=-100).

    x:     logits with shape (..., C)   (any number of leading dims, any float dtype)
    label: int labels with shape (...)  (same leading dims as x)
    Returns scalar mean cross-entropy loss (float32).
    """
    assert x.ndim == label.ndim + 1
    C = x.shape[-1]
    x2 = x.reshape(-1, C)                                      # keep original dtype
    lab = label.reshape(-1).astype(jnp.int32)                  # (N,)
    N = x2.shape[0]

    if row_tile is None:
        row_tile = _pick_row_tile(N, C, x2.dtype.itemsize)
    row_tile = max(8, (int(row_tile) // 8) * 8)

    n_pad = ((N + row_tile - 1) // row_tile) * row_tile
    if n_pad != N:
        x2 = jnp.pad(x2, ((0, n_pad - N), (0, 0)))
        lab = jnp.pad(lab, (0, n_pad - N), constant_values=-1)  # padded rows -> ignored
    lab2 = lab.reshape(-1, 1)

    grid = (n_pad // row_tile,)
    per_row = pl.pallas_call(
        _ce_kernel,
        out_shape=jax.ShapeDtypeStruct((n_pad, 1), jnp.float32),
        grid_spec=pltpu.PrefetchScalarGridSpec(
            num_scalar_prefetch=0,
            grid=grid,
            in_specs=[
                pl.BlockSpec((row_tile, C), lambda i: (i, 0)),
                pl.BlockSpec((row_tile, 1), lambda i: (i, 0)),
            ],
            out_specs=pl.BlockSpec((row_tile, 1), lambda i: (i, 0)),
        ),
        compiler_params=pltpu.CompilerParams(
            dimension_semantics=("parallel",),
            vmem_limit_bytes=48 * 1024 * 1024,
        ),
    )(x2, lab2)

    # mean over valid (non-ignored, non-padded) rows — divisor uses the true count
    valid = (lab2[:, 0] >= 0) & (lab2[:, 0] < C)
    n_valid = jnp.sum(valid).astype(jnp.float32)
    return jnp.sum(per_row[:, 0]) / n_valid


if __name__ == "__main__":
    key = jax.random.PRNGKey(0)
    kx, kl = jax.random.split(key)

    # small shapes implied by the forward: (batch, seq, num_classes) logits,
    # (batch, seq) integer labels
    batch, seq, num_classes = 2, 4, 32
    x = jax.random.normal(kx, (batch, seq, num_classes), dtype=jnp.float32)
    label = jax.random.randint(kl, (batch, seq), 0, num_classes, dtype=jnp.int32)
    label = label.at[0, 0].set(-100)   # exercise nn.CrossEntropyLoss ignore_index

    loss = entropy_loss(x, label)
    loss = jax.block_until_ready(loss)

    # reference check in plain JAX (ignore_index=-100, mean reduction)
    x2 = x.reshape(-1, num_classes).astype(jnp.float32)
    lab2 = label.reshape(-1)
    valid = lab2 != -100
    logp = jax.nn.log_softmax(x2, axis=-1)
    picked = logp[jnp.arange(lab2.shape[0]), jnp.where(valid, lab2, 0)]
    ref = -jnp.sum(jnp.where(valid, picked, 0.0)) / jnp.sum(valid)
    assert jnp.allclose(loss, ref, atol=1e-5, rtol=1e-5), (loss, ref)

    # also exercise the no-precast low-precision path (bf16 streamed as-is)
    loss_bf16 = jax.block_until_ready(entropy_loss(x.astype(jnp.bfloat16), label))
    assert jnp.allclose(loss_bf16, ref, atol=5e-2, rtol=5e-2), (loss_bf16, ref)

    print("KERNEL_OK")
</pallas_src>

<mosaic_0001>
module attributes {stable_mosaic.version = 11 : i64} {
  func.func @_ce_kernel(%arg0: i32, %arg1: memref<8x32xf32, #tpu.memory_space<vmem>>, %arg2: memref<8x1xi32, #tpu.memory_space<vmem>>, %arg3: memref<8x1xf32, #tpu.memory_space<vmem>>) attributes {dimension_semantics = [#tpu.dimension_semantics<parallel>], iteration_bounds = array<i64: 1>, scalar_prefetch = 0 : i64, scratch_operands = 0 : i64, tpu.core_type = #tpu.core_type<tc>, window_params = [{transform_indices = @transform_0, window_bounds = array<i64: 8, 32>}, {transform_indices = @transform_1, window_bounds = array<i64: 8, 1>}, {transform_indices = @transform_2, window_bounds = array<i64: 8, 1>}]} {
    %c0 = arith.constant 0 : index
    %c0_0 = arith.constant 0 : index
    %0 = vector.load %arg1[%c0, %c0_0] : memref<8x32xf32, #tpu.memory_space<vmem>>, vector<8x32xf32>
    %c0_1 = arith.constant 0 : index
    %c0_2 = arith.constant 0 : index
    %1 = vector.load %arg2[%c0_1, %c0_2] : memref<8x1xi32, #tpu.memory_space<vmem>>, vector<8x1xi32>
    %cst = arith.constant dense<0xFF800000> : vector<8xf32>
    %2 = vector.multi_reduction <maximumf>, %0, %cst [1] : vector<8x32xf32> to vector<8xf32>
    %3 = vector.shape_cast %2 : vector<8xf32> to vector<8x1xf32>
    %4 = vector.broadcast %3 : vector<8x1xf32> to vector<8x32xf32>
    %5 = arith.subf %0, %4 : vector<8x32xf32>
    %6 = math.exp %5 : vector<8x32xf32>
    %cst_3 = arith.constant dense<0.000000e+00> : vector<8xf32>
    %7 = vector.multi_reduction <add>, %6, %cst_3 [1] : vector<8x32xf32> to vector<8xf32>
    %8 = vector.shape_cast %7 : vector<8xf32> to vector<8x1xf32>
    %9 = math.log %8 : vector<8x1xf32>
    %10 = arith.addf %3, %9 : vector<8x1xf32>
    %11 = tpu.iota {dimensions = array<i32: 1>} : vector<8x32xi32>
    %12 = vector.broadcast %1 : vector<8x1xi32> to vector<8x32xi32>
    %13 = arith.cmpi eq, %11, %12 : vector<8x32xi32>
    %cst_4 = arith.constant 0.000000e+00 : f32
    %14 = vector.broadcast %cst_4 : f32 to vector<8x32xf32>
    %15 = arith.select %13, %0, %14 : vector<8x32xi1>, vector<8x32xf32>
    %cst_5 = arith.constant dense<0.000000e+00> : vector<8xf32>
    %16 = vector.multi_reduction <add>, %15, %cst_5 [1] : vector<8x32xf32> to vector<8xf32>
    %17 = vector.shape_cast %16 : vector<8xf32> to vector<8x1xf32>
    %c0_i32 = arith.constant 0 : i32
    %18 = vector.broadcast %c0_i32 : i32 to vector<8x1xi32>
    %19 = arith.cmpi sge, %1, %18 : vector<8x1xi32>
    %c32_i32 = arith.constant 32 : i32
    %20 = vector.broadcast %c32_i32 : i32 to vector<8x1xi32>
    %21 = arith.cmpi slt, %1, %20 : vector<8x1xi32>
    %22 = arith.andi %19, %21 : vector<8x1xi1>
    %23 = arith.subf %10, %17 : vector<8x1xf32>
    %cst_6 = arith.constant 0.000000e+00 : f32
    %24 = vector.broadcast %cst_6 : f32 to vector<8x1xf32>
    %25 = arith.select %22, %23, %24 : vector<8x1xi1>, vector<8x1xf32>
    %c0_7 = arith.constant 0 : index
    %c0_8 = arith.constant 0 : index
    %26 = vector.load %arg3[%c0_7, %c0_8] : memref<8x1xf32, #tpu.memory_space<vmem>>, vector<8x1xf32>
    tpu.vector_store %arg3[%c0_7, %c0_8], %25 {strides = array<i32>} : memref<8x1xf32, #tpu.memory_space<vmem>>, vector<8x1xf32>,
    return
  }
  func.func @transform_0(%arg0: i32) -> (i32, i32) {
    %c0_i32 = arith.constant 0 : i32
    %c0_i32_0 = arith.constant 0 : i32
    return %arg0, %c0_i32 : i32, i32
  }
  func.func @transform_1(%arg0: i32) -> (i32, i32) {
    %c0_i32 = arith.constant 0 : i32
    %c0_i32_0 = arith.constant 0 : i32
    return %arg0, %c0_i32 : i32, i32
  }
  func.func @transform_2(%arg0: i32) -> (i32, i32) {
    %c0_i32 = arith.constant 0 : i32
    %c0_i32_0 = arith.constant 0 : i32
    return %arg0, %c0_i32 : i32, i32
  }
}

</mosaic_0001>

<bundles_post_ra>
// kernel: tpu_custom_call.1
= control target key start
LH: loop header
LB: loop body
LE: loop exit
PB: predicated region body
PF: predicated region fallthrough
CT: control target
= control target key end

     0   :  { %vm13_vm0 = vcmask 261120   ;;  %v53_v1 = vmov 0   ;;  %v26_v7 = vlaneseq  ;;  %vm41_vm5 = vcmask 7168   ;;  %s81_s0 = inlined_call_operand.vmem [shape: f32[8,32], index: 0, kind: input, shape index: {}]   ;;  %s82_s1 = inlined_call_operand.vmem [shape: s32[8,1], index: 1, kind: input, shape index: {}]   ;;  %s83_s2 = inlined_call_operand.vmem [shape: f32[8,1], index: 2, kind: output, shape index: {}]  }
   0x1   :  { %v11_v0 = vld [vmem:[%s81_s0] sm:$0xff]  ;;  %48 = vset.pattern.permute.xlu0 %v53_v1 }
   0x2   :  { %v14_v2 = vsel %vm13_vm0, %v11_v0, -inf  ;;  %v12_v3 = vld [vmem:[%s82_s1] sm:$0xff]  ;;  %v27_v8 = vand.u32 127, %v26_v7 }
   0x3   :  { %15 = vmax.xlane.f32.xlu0 %v14_v2  ;;  %vm36_vm2 = vcmp.ge.s32.totalorder %v12_v3, 0  ;;  %vm37_vm3 = vcmp.lt.s32.totalorder %v12_v3, 32 }
   0x4   :  { %vm38_vm4 = vmand %vm36_vm2, %vm37_vm3 }
  0x19   :  { %29 = vperm.xlu0 %48, %v12_v3  }
  0x90   :  { %v16_v4 = vpop.xlane.xlu0 %15 }
  0x91   :  { %v17_v5 = vsub.f32 %v11_v0, %v16_v4 }
  0x93   :  { %v18_v6 = vmul.f32 1.442695, %v17_v5 }
  0x95   :  { %49 = vpow2.f32 %v18_v6 }
  0x98   :  { %v30_v9 = vpop.permute.xlu0 %29 }
  0x99   :  { %vm31_vm1 = vcmp.eq.s32.totalorder %v27_v8, %v30_v9 }
  0x9a   :  { %v32_v11 = vsel %vm31_vm1, %v11_v0, 0.0 }
  0x9b   :  { %v33_v13 = vsel %vm13_vm0, %v32_v11, 0.0 }
  0x9f   :  { %v50_v10 = vpop.eup %49 }
  0xa0   :  { %v20_v12 = vsel %vm13_vm0, %v50_v10, 0.0 }
  0xa1   :  { %21 = vadd.xlane.f32.xlu1 %v20_v12 }
  0xa5   :  { %34 = vadd.xlane.f32.xlu1 %v33_v13 }
 0x12e   :  { %v22_v14 = vpop.xlane.xlu1 %21 }
 0x12f   :  { %51 = vlog2.f32 %v22_v14 }
 0x132   :  { %v35_v17 = vpop.xlane.xlu1 %34 }
 0x139   :  { %v52_v15 = vpop.eup %51 }
 0x13a   :  { %v24_v16 = vmul.f32 0.6931472, %v52_v15 }
 0x13c   :  { %v25_v18 = vadd.f32 %v24_v16, %v16_v4 }
 0x13e   :  { %v39_v19 = vsub.f32 %v25_v18, %v35_v17 }
 0x140   :  { %v40_v20 = vsel %vm38_vm4, %v39_v19, 0.0 }
 0x141   :  { %42 = vst.msk [vmem:[%s83_s2] sm:$0xff] %vm41_vm5, %v40_v20 }

</bundles_post_ra>
